<compile_context>
chip_gen: v7x
topology: tpu7x:2x2x1
jax: 0.10.0
libtpu: 0.0.40
codegen_flags: <defaults>
</compile_context>

<pallas_src>
import functools
import math

import numpy as np
import jax
import jax.numpy as jnp
from jax import lax
from jax.experimental import pallas as pl
from jax.experimental.pallas import tpu as pltpu


# ----------------------------------------------------------------------------
# Glue: build the (L, L) forward / inverse full-level Haar DWT matrices.
# dwt(v)  == v @ D    and    idwt(v) == v @ Di   (applied along the last axis)
# TODO(synk): for L >= 2048 (v7x) / 4096 (v5e/v6e) these dense operators no
# longer fit VMEM; tile them over an 'arbitrary' reduction grid axis or switch
# to the O(L log L) butterfly instead of loading them whole.
# ----------------------------------------------------------------------------
def _haar_dwt_matrix(length: int) -> np.ndarray:
    level = int(np.floor(np.log2(length)))          # filter_len == 2
    m = np.eye(length, dtype=np.float64)
    inv_s2 = 1.0 / np.sqrt(2.0)
    for l in range(level):
        n = length >> l
        seg = m[:, :n]
        even, odd = seg[:, 0::2], seg[:, 1::2]
        c = (even + odd) * inv_s2
        d = (even - odd) * inv_s2
        m = np.concatenate([c, d, m[:, n:]], axis=1)
    return m.astype(np.float32)


def _haar_idwt_matrix(length: int) -> np.ndarray:
    level = int(np.floor(np.log2(length)))
    m = np.eye(length, dtype=np.float64)
    inv_s2 = 1.0 / np.sqrt(2.0)
    for l in range(level - 1, -1, -1):
        n = length >> l
        seg = m[:, :n]
        c, d = seg[:, : n // 2], seg[:, n // 2:]
        even = (c + d) * inv_s2
        odd = (c - d) * inv_s2
        inter = np.empty_like(seg)
        inter[:, 0::2] = even
        inter[:, 1::2] = odd
        m = np.concatenate([inter, m[:, n:]], axis=1)
    return m.astype(np.float32)


# ----------------------------------------------------------------------------
# Hardware query + tiling / VMEM budgets (generation-aware).
# ----------------------------------------------------------------------------
def _vmem_capacity_bytes():
    # Broad except here only guards the *hardware query*; it never masks
    # compile/runtime errors of the kernel itself.
    try:
        cap = getattr(pltpu.get_tpu_info(), "vmem_capacity_bytes", None)
        if cap:
            return int(cap)
    except Exception:
        pass
    return 64 << 20                                   # conservative (v7x physical VMEM)


def _pick_batch_tile(b, w, l, keep, vmem_cap):
    """Batch elements per grid step."""
    f32 = 4
    # tb granularity so the (tb*w, L) block's sublane dim is a multiple of 8
    gran = 8 // math.gcd(w, 8)
    budget = min(max(vmem_cap - (16 << 20), 24 << 20), 112 << 20)
    invariant = (w * w * keep + 2 * l * l) * f32      # weights + D + Di (single-buffered)
    # per-batch-element footprint: double-buffered x/out blocks (4x), coeff+mix
    # scratch (2x) and ~4 live f32 temporaries in the body.
    per_b = 10 * w * l * f32
    cap = (budget - invariant - (4 << 20)) // per_b
    cap = max(gran, (cap // gran) * gran)
    target = min(512, cap)                            # ~512 MXU rows / step amortizes overhead
    if target >= b:
        if b >= 16:
            # split into >= 2 steps so both v7x TensorCores get work
            tb = -(-((b + 1) // 2) // gran) * gran
        else:
            tb = b                                    # one step; block covers the full row dim
    else:
        tb = target
        # prefer a nearby tile that divides B exactly (avoids the batch-pad pass)
        for cand in range(target, max(target - 16 * gran, gran) - 1, -gran):
            if b % cand == 0:
                tb = cand
                break
    return int(max(1, tb))


def _vmem_limit_bytes(tb, w, l, keep, nbuf_inv, vmem_cap):
    f32 = 4
    need = (10 * tb * w * l + nbuf_inv * (w * w * keep + 2 * l * l)) * f32 + (4 << 20)
    cap = min(max(vmem_cap - (8 << 20), 24 << 20), 120 << 20)
    return int(min(max(need, 24 << 20), cap))


# ----------------------------------------------------------------------------
# Primary Pallas kernel: fused DWT / mix / IDWT on a (TB*W, L) row block.
# ----------------------------------------------------------------------------
def _wavelet_fused_kernel(x_ref, w_ref, d_ref, di_ref, o_ref, coeff_ref, mix_ref,
                          *, mxu_dtype):
    # x_ref / o_ref      : (TB*W, L)  row-major (batch-major, channel-minor) 2-D view
    # w_ref              : (W, W, KEEP) mixing weights            (grid-invariant)
    # d_ref / di_ref     : (L, L) full-level Haar DWT / IDWT ops  (grid-invariant)
    # coeff_ref / mix_ref: (TB*W, L) f32 VMEM scratch
    w_dim = w_ref.shape[0]
    keep = w_ref.shape[2]
    tbw, l_dim = x_ref.shape
    tb = tbw // w_dim

    dmat = d_ref[...].astype(mxu_dtype)
    dimat = di_ref[...].astype(mxu_dtype)
    wts = w_ref[...]

    # ---- forward full-level Haar DWT: ONE fused (TB*W, L) @ (L, L) MXU matmul
    coeff = jnp.dot(x_ref[...].astype(mxu_dtype), dmat,
                    preferred_element_type=jnp.float32)
    if keep < l_dim:
        # statically dead in the asserted keep == input_len configuration
        pos = lax.broadcasted_iota(jnp.int32, coeff.shape, 1)
        coeff = jnp.where(pos < keep, coeff, 0.0)
    coeff_ref[...] = coeff

    # ---- per-position channel mixing on the VPU.  Channel i of the block is the
    #      strided row set {i, i+W, i+2W, ...}; pulled from / pushed to VMEM
    #      scratch with strided row accesses (no HBM involvement).
    # TODO(synk): for W in the tens with large L, move this mixing to bf16 / an
    # MXU contraction blocked over positions (the f32 VALU becomes the
    # saturating unit on v6e/v7x); a no-op at small W.
    chans = [coeff_ref[pl.ds(i, tb, stride=w_dim), :] for i in range(w_dim)]
    for o in range(w_dim):
        acc = chans[0] * wts[0, o:o + 1]
        for i in range(1, w_dim):
            acc = acc + chans[i] * wts[i, o:o + 1]
        mix_ref[pl.ds(o, tb, stride=w_dim), :] = acc

    # ---- inverse full-level Haar DWT: ONE fused matmul + ONE full-block store
    out = jnp.dot(mix_ref[...].astype(mxu_dtype), dimat,
                  preferred_element_type=jnp.float32)
    # TODO(synk): for L < 128 the matmuls/stores are lane-masked; a block-diagonal
    # packed operator (k = 128/L rows per lane row) would make them lane-dense.
    o_ref[...] = out.astype(o_ref.dtype)


# ----------------------------------------------------------------------------
# Compatibility fallback kernel (previous, known-good channel-major structure).
# Only used if the fused kernel's strided VMEM accesses / single-buffered
# invariants are rejected by the running Mosaic build.
# ----------------------------------------------------------------------------
def _wavelet_slab_kernel(x_ref, w_ref, d_ref, di_ref, o_ref, *, mxu_dtype):
    # x_ref/o_ref: (W, TB, L) channel-major blocks
    w_dim, _, l_dim = x_ref.shape
    keep = w_ref.shape[2]
    dmat = d_ref[...].astype(mxu_dtype)
    dimat = di_ref[...].astype(mxu_dtype)
    wts = w_ref[...]
    coeffs = []
    for i in range(w_dim):
        c = jnp.dot(x_ref[i].astype(mxu_dtype), dmat,
                    preferred_element_type=jnp.float32)
        if keep < l_dim:
            pos = lax.broadcasted_iota(jnp.int32, c.shape, 1)
            c = jnp.where(pos < keep, c, 0.0)
        coeffs.append(c)
    for o in range(w_dim):
        acc = coeffs[0] * wts[0, o:o + 1]
        for i in range(1, w_dim):
            acc = acc + coeffs[i] * wts[i, o:o + 1]
        o_ref[o] = jnp.dot(acc.astype(mxu_dtype), dimat,
                           preferred_element_type=jnp.float32).astype(o_ref.dtype)


# ----------------------------------------------------------------------------
# Wrapper.
# ----------------------------------------------------------------------------
def wavelet_block_1d(x, weights, keep, matmul_dtype=jnp.float32):
    """WaveletBlock1d forward.  x: (B, W, L) float32, weights: (W, W, keep).

    matmul_dtype=jnp.bfloat16 trades ~1e-3 relative error for 2-3x MXU
    throughput on v6e/v7x (f32 default keeps the rtol=1e-4 validation)."""
    b, w, l = x.shape
    assert l != 0 and (l & (l - 1)) == 0, "input_len must be a power of 2"
    # TODO(synk): the reference torch.einsum('bix,iox->box', z, weights) only
    # type-checks when keep == input_len (otherwise PyTorch raises); that is the
    # only configuration reproduced here.
    assert keep == l and weights.shape == (w, w, keep)

    vmem_cap = _vmem_capacity_bytes()
    tb = _pick_batch_tile(b, w, l, keep, vmem_cap)
    grid_n = pl.cdiv(b, tb)
    b_pad = grid_n * tb

    dmat = jnp.asarray(_haar_dwt_matrix(l))
    dimat = jnp.asarray(_haar_idwt_matrix(l))
    weights_f32 = weights.astype(jnp.float32)

    cost = pl.CostEstimate(
        flops=int(4 * w * b_pad * l * l + 2 * w * w * b_pad * l),
        transcendentals=0,
        bytes_accessed=int((2 * b_pad * w * l + w * w * keep + 2 * l * l) * 4),
    )

    # Free row-major 2-D view: no transpose / relayout pass over HBM.
    x2 = x.astype(jnp.float32).reshape(b * w, l)
    if b_pad != b:
        # only hit when no batch tile divides B; costs one extra pass over x
        x2 = jnp.pad(x2, ((0, (b_pad - b) * w), (0, 0)))

    fused_kernel = functools.partial(_wavelet_fused_kernel, mxu_dtype=matmul_dtype)

    def _fused_call(single_buffer_invariants):
        def _inv_spec(shape):
            zero = lambda g, _n=len(shape): (0,) * _n
            if single_buffer_invariants:
                return pl.BlockSpec(shape, zero, pipeline_mode=pl.Buffered(1))
            return pl.BlockSpec(shape, zero)

        nbuf = 1 if single_buffer_invariants else 2
        out2 = pl.pallas_call(
            fused_kernel,
            out_shape=jax.ShapeDtypeStruct((b_pad * w, l), jnp.float32),
            grid=(grid_n,),
            in_specs=[
                pl.BlockSpec((tb * w, l), lambda g: (g, 0)),     # x, 2-D view
                _inv_spec((w, w, keep)),                         # mixing weights
                _inv_spec((l, l)),                               # DWT operator
                _inv_spec((l, l)),                               # IDWT operator
            ],
            out_specs=pl.BlockSpec((tb * w, l), lambda g: (g, 0)),
            scratch_shapes=[pltpu.VMEM((tb * w, l), jnp.float32),   # DWT coefficients
                            pltpu.VMEM((tb * w, l), jnp.float32)],  # mixed coefficients
            compiler_params=pltpu.CompilerParams(
                dimension_semantics=("parallel",),
                vmem_limit_bytes=_vmem_limit_bytes(tb, w, l, keep, nbuf, vmem_cap),
            ),
            cost_estimate=cost,
        )(x2, weights_f32, dmat, dimat)
        if b_pad != b:
            out2 = out2[: b * w]
        return out2.reshape(b, w, l)

    def _slab_call():
        # Previous channel-major structure: wrapper transpose + per-channel
        # matmuls.  Correct but slower (extra HBM passes); only a fallback.
        tbf = b if b <= tb else max(8, (tb // 8) * 8)
        grid_f = pl.cdiv(b, tbf)
        b_pf = grid_f * tbf
        x_t = jnp.transpose(x.astype(jnp.float32), (1, 0, 2))
        if b_pf != b:
            x_t = jnp.pad(x_t, ((0, 0), (0, b_pf - b), (0, 0)))
        out_t = pl.pallas_call(
            functools.partial(_wavelet_slab_kernel, mxu_dtype=matmul_dtype),
            out_shape=jax.ShapeDtypeStruct((w, b_pf, l), jnp.float32),
            grid=(grid_f,),
            in_specs=[
                pl.BlockSpec((w, tbf, l), lambda g: (0, g, 0)),
                pl.BlockSpec((w, w, keep), lambda g: (0, 0, 0)),
                pl.BlockSpec((l, l), lambda g: (0, 0)),
                pl.BlockSpec((l, l), lambda g: (0, 0)),
            ],
            out_specs=pl.BlockSpec((w, tbf, l), lambda g: (0, g, 0)),
            compiler_params=pltpu.CompilerParams(
                dimension_semantics=("parallel",),
                vmem_limit_bytes=_vmem_limit_bytes(tbf, w, l, keep, 2, vmem_cap),
            ),
            cost_estimate=cost,
        )(x_t, weights_f32, dmat, dimat)
        if b_pf != b:
            out_t = out_t[:, :b, :]
        return jnp.transpose(out_t, (1, 0, 2))

    # Narrow compatibility ladder: only trace/lowering-type failures fall
    # through (pl.Buffered / strided-ref support differs across jax builds).
    # Runtime failures (incl. VMEM OOM = XlaRuntimeError) propagate immediately.
    attempts = (
        lambda: _fused_call(True),     # fused kernel, single-buffered invariants
        lambda: _fused_call(False),    # fused kernel, double-buffered invariants
        _slab_call,                    # previous channel-major structure
    )
    last_err = None
    for attempt in attempts:
        try:
            return attempt()
        except (pltpu.LoweringException, NotImplementedError, ValueError, TypeError) as e:
            last_err = e
    raise last_err


# ----------------------------------------------------------------------------
# Pure-numpy reference mirroring the PyTorch forward, for verification.
# ----------------------------------------------------------------------------
def _reference_forward(x, weights, keep):
    b, w, l = x.shape
    level = int(np.floor(np.log2(l)))
    s2 = np.float32(1.0 / np.sqrt(2.0))

    y = x.astype(np.float32).copy()
    for lvl in range(level):                       # HaarDWT.forward
        n = l >> lvl
        seg = y[:, :, :n]
        even, odd = seg[:, :, 0::2], seg[:, :, 1::2]
        c = (even + odd) * s2
        d = (even - odd) * s2
        y = y.copy()
        y[:, :, :n] = np.concatenate([c, d], axis=-1)

    z = np.zeros_like(y)
    z[:, :, :keep] = y[:, :, :keep]
    mixed = np.einsum('bix,iox->box', z, weights)  # requires keep == l

    y = mixed.astype(np.float32).copy()
    for lvl in range(level - 1, -1, -1):           # IHaarDWT.forward
        n = l >> lvl
        seg = y[:, :, :n]
        c, d = seg[:, :, : n // 2], seg[:, :, n // 2:]
        even = (c + d) * s2
        odd = (c - d) * s2
        inter = np.empty_like(seg)
        inter[:, :, 0::2] = even
        inter[:, :, 1::2] = odd
        y = y.copy()
        y[:, :, :n] = inter
    return y


if __name__ == "__main__":
    B, W, L = 2, 4, 16
    KEEP = L                                       # reference einsum requires keep == input_len

    key = jax.random.PRNGKey(0)
    kx, kw = jax.random.split(key)
    x = jax.random.normal(kx, (B, W, L), dtype=jnp.float32)
    scale = 1.0 / (W ** 2)                         # same init recipe as the module
    weights = scale * jax.random.uniform(kw, (W, W, KEEP), dtype=jnp.float32)

    out = wavelet_block_1d(x, weights, KEEP)
    out = jax.block_until_ready(out)

    ref = _reference_forward(np.asarray(x), np.asarray(weights), KEEP)
    np.testing.assert_allclose(np.asarray(out), ref, rtol=1e-4, atol=1e-4)
    print("KERNEL_OK")
</pallas_src>

<mosaic_0001>
module attributes {stable_mosaic.version = 11 : i64} {
  func.func @_wavelet_fused_kernel(%arg0: i32, %arg1: memref<8x16xf32, #tpu.memory_space<vmem>>, %arg2: memref<4x4x16xf32, #tpu.memory_space<vmem>>, %arg3: memref<16x16xf32, #tpu.memory_space<vmem>>, %arg4: memref<16x16xf32, #tpu.memory_space<vmem>>, %arg5: memref<8x16xf32, #tpu.memory_space<vmem>>, %arg6: memref<8x16xf32, #tpu.memory_space<vmem>>, %arg7: memref<8x16xf32, #tpu.memory_space<vmem>>) attributes {dimension_semantics = [#tpu.dimension_semantics<parallel>], iteration_bounds = array<i64: 1>, scalar_prefetch = 0 : i64, scratch_operands = 2 : i64, tpu.core_type = #tpu.core_type<tc>, window_params = [{transform_indices = @transform_0, window_bounds = array<i64: 8, 16>}, {pipeline_mode = #tpu.pipeline_mode<synchronous>, transform_indices = @transform_1, window_bounds = array<i64: 4, 4, 16>}, {pipeline_mode = #tpu.pipeline_mode<synchronous>, transform_indices = @transform_2, window_bounds = array<i64: 16, 16>}, {pipeline_mode = #tpu.pipeline_mode<synchronous>, transform_indices = @transform_3, window_bounds = array<i64: 16, 16>}, {transform_indices = @transform_4, window_bounds = array<i64: 8, 16>}]} {
    %c0 = arith.constant 0 : index
    %c0_0 = arith.constant 0 : index
    %0 = vector.load %arg3[%c0, %c0_0] : memref<16x16xf32, #tpu.memory_space<vmem>>, vector<16x16xf32>
    %c0_1 = arith.constant 0 : index
    %c0_2 = arith.constant 0 : index
    %1 = vector.load %arg4[%c0_1, %c0_2] : memref<16x16xf32, #tpu.memory_space<vmem>>, vector<16x16xf32>
    %c0_3 = arith.constant 0 : index
    %c0_4 = arith.constant 0 : index
    %c0_5 = arith.constant 0 : index
    %2 = vector.load %arg2[%c0_3, %c0_4, %c0_5] : memref<4x4x16xf32, #tpu.memory_space<vmem>>, vector<4x4x16xf32>
    %c0_6 = arith.constant 0 : index
    %c0_7 = arith.constant 0 : index
    %3 = vector.load %arg1[%c0_6, %c0_7] : memref<8x16xf32, #tpu.memory_space<vmem>>, vector<8x16xf32>
    %cst = arith.constant dense<0.000000e+00> : vector<8x16xf32>
    %4 = tpu.matmul %3, %0, %cst {dimension_numbers = #tpu.dot_dimension_numbers<[1], [0], [0], [1], [0, 0, 1, 1], [], []>} : vector<8x16xf32>, vector<16x16xf32>, vector<8x16xf32> -> vector<8x16xf32>
    %c0_8 = arith.constant 0 : index
    %c0_9 = arith.constant 0 : index
    %5 = vector.load %arg6[%c0_8, %c0_9] : memref<8x16xf32, #tpu.memory_space<vmem>>, vector<8x16xf32>
    tpu.vector_store %arg6[%c0_8, %c0_9], %4 {strides = array<i32>} : memref<8x16xf32, #tpu.memory_space<vmem>>, vector<8x16xf32>,
    %c0_10 = arith.constant 0 : index
    %c0_11 = arith.constant 0 : index
    %6 = tpu.strided_load %arg6[%c0_10, %c0_11] {strides = array<i32: 4, 1>} : memref<8x16xf32, #tpu.memory_space<vmem>>, vector<2x16xf32>
    %c1 = arith.constant 1 : index
    %c0_12 = arith.constant 0 : index
    %7 = tpu.strided_load %arg6[%c1, %c0_12] {strides = array<i32: 4, 1>} : memref<8x16xf32, #tpu.memory_space<vmem>>, vector<2x16xf32>
    %c2 = arith.constant 2 : index
    %c0_13 = arith.constant 0 : index
    %8 = tpu.strided_load %arg6[%c2, %c0_13] {strides = array<i32: 4, 1>} : memref<8x16xf32, #tpu.memory_space<vmem>>, vector<2x16xf32>
    %c3 = arith.constant 3 : index
    %c0_14 = arith.constant 0 : index
    %9 = tpu.strided_load %arg6[%c3, %c0_14] {strides = array<i32: 4, 1>} : memref<8x16xf32, #tpu.memory_space<vmem>>, vector<2x16xf32>
    %10 = vector.extract_strided_slice %2 {offsets = [0, 0, 0], sizes = [1, 1, 16], strides = [1, 1, 1]} : vector<4x4x16xf32> to vector<1x1x16xf32>
    %11 = vector.shape_cast %10 : vector<1x1x16xf32> to vector<1x16xf32>
    %12 = vector.broadcast %11 : vector<1x16xf32> to vector<2x16xf32>
    %13 = arith.mulf %6, %12 : vector<2x16xf32>
    %14 = vector.extract_strided_slice %2 {offsets = [1, 0, 0], sizes = [1, 1, 16], strides = [1, 1, 1]} : vector<4x4x16xf32> to vector<1x1x16xf32>
    %15 = vector.shape_cast %14 : vector<1x1x16xf32> to vector<1x16xf32>
    %16 = vector.broadcast %15 : vector<1x16xf32> to vector<2x16xf32>
    %17 = arith.mulf %7, %16 : vector<2x16xf32>
    %18 = arith.addf %13, %17 : vector<2x16xf32>
    %19 = vector.extract_strided_slice %2 {offsets = [2, 0, 0], sizes = [1, 1, 16], strides = [1, 1, 1]} : vector<4x4x16xf32> to vector<1x1x16xf32>
    %20 = vector.shape_cast %19 : vector<1x1x16xf32> to vector<1x16xf32>
    %21 = vector.broadcast %20 : vector<1x16xf32> to vector<2x16xf32>
    %22 = arith.mulf %8, %21 : vector<2x16xf32>
    %23 = arith.addf %18, %22 : vector<2x16xf32>
    %24 = vector.extract_strided_slice %2 {offsets = [3, 0, 0], sizes = [1, 1, 16], strides = [1, 1, 1]} : vector<4x4x16xf32> to vector<1x1x16xf32>
    %25 = vector.shape_cast %24 : vector<1x1x16xf32> to vector<1x16xf32>
    %26 = vector.broadcast %25 : vector<1x16xf32> to vector<2x16xf32>
    %27 = arith.mulf %9, %26 : vector<2x16xf32>
    %28 = arith.addf %23, %27 : vector<2x16xf32>
    %c0_15 = arith.constant 0 : index
    %c0_16 = arith.constant 0 : index
    %29 = tpu.strided_load %arg7[%c0_15, %c0_16] {strides = array<i32: 4, 1>} : memref<8x16xf32, #tpu.memory_space<vmem>>, vector<2x16xf32>
    tpu.strided_store %arg7[%c0_15, %c0_16], %28 {strides = array<i32: 4, 1>} : memref<8x16xf32, #tpu.memory_space<vmem>>, vector<2x16xf32>
    %30 = vector.extract_strided_slice %2 {offsets = [0, 1, 0], sizes = [1, 1, 16], strides = [1, 1, 1]} : vector<4x4x16xf32> to vector<1x1x16xf32>
    %31 = vector.shape_cast %30 : vector<1x1x16xf32> to vector<1x16xf32>
    %32 = vector.broadcast %31 : vector<1x16xf32> to vector<2x16xf32>
    %33 = arith.mulf %6, %32 : vector<2x16xf32>
    %34 = vector.extract_strided_slice %2 {offsets = [1, 1, 0], sizes = [1, 1, 16], strides = [1, 1, 1]} : vector<4x4x16xf32> to vector<1x1x16xf32>
    %35 = vector.shape_cast %34 : vector<1x1x16xf32> to vector<1x16xf32>
    %36 = vector.broadcast %35 : vector<1x16xf32> to vector<2x16xf32>
    %37 = arith.mulf %7, %36 : vector<2x16xf32>
    %38 = arith.addf %33, %37 : vector<2x16xf32>
    %39 = vector.extract_strided_slice %2 {offsets = [2, 1, 0], sizes = [1, 1, 16], strides = [1, 1, 1]} : vector<4x4x16xf32> to vector<1x1x16xf32>
    %40 = vector.shape_cast %39 : vector<1x1x16xf32> to vector<1x16xf32>
    %41 = vector.broadcast %40 : vector<1x16xf32> to vector<2x16xf32>
    %42 = arith.mulf %8, %41 : vector<2x16xf32>
    %43 = arith.addf %38, %42 : vector<2x16xf32>
    %44 = vector.extract_strided_slice %2 {offsets = [3, 1, 0], sizes = [1, 1, 16], strides = [1, 1, 1]} : vector<4x4x16xf32> to vector<1x1x16xf32>
    %45 = vector.shape_cast %44 : vector<1x1x16xf32> to vector<1x16xf32>
    %46 = vector.broadcast %45 : vector<1x16xf32> to vector<2x16xf32>
    %47 = arith.mulf %9, %46 : vector<2x16xf32>
    %48 = arith.addf %43, %47 : vector<2x16xf32>
    %c1_17 = arith.constant 1 : index
    %c0_18 = arith.constant 0 : index
    %49 = tpu.strided_load %arg7[%c1_17, %c0_18] {strides = array<i32: 4, 1>} : memref<8x16xf32, #tpu.memory_space<vmem>>, vector<2x16xf32>
    tpu.strided_store %arg7[%c1_17, %c0_18], %48 {strides = array<i32: 4, 1>} : memref<8x16xf32, #tpu.memory_space<vmem>>, vector<2x16xf32>
    %50 = vector.extract_strided_slice %2 {offsets = [0, 2, 0], sizes = [1, 1, 16], strides = [1, 1, 1]} : vector<4x4x16xf32> to vector<1x1x16xf32>
    %51 = vector.shape_cast %50 : vector<1x1x16xf32> to vector<1x16xf32>
    %52 = vector.broadcast %51 : vector<1x16xf32> to vector<2x16xf32>
    %53 = arith.mulf %6, %52 : vector<2x16xf32>
    %54 = vector.extract_strided_slice %2 {offsets = [1, 2, 0], sizes = [1, 1, 16], strides = [1, 1, 1]} : vector<4x4x16xf32> to vector<1x1x16xf32>
    %55 = vector.shape_cast %54 : vector<1x1x16xf32> to vector<1x16xf32>
    %56 = vector.broadcast %55 : vector<1x16xf32> to vector<2x16xf32>
    %57 = arith.mulf %7, %56 : vector<2x16xf32>
    %58 = arith.addf %53, %57 : vector<2x16xf32>
    %59 = vector.extract_strided_slice %2 {offsets = [2, 2, 0], sizes = [1, 1, 16], strides = [1, 1, 1]} : vector<4x4x16xf32> to vector<1x1x16xf32>
    %60 = vector.shape_cast %59 : vector<1x1x16xf32> to vector<1x16xf32>
    %61 = vector.broadcast %60 : vector<1x16xf32> to vector<2x16xf32>
    %62 = arith.mulf %8, %61 : vector<2x16xf32>
    %63 = arith.addf %58, %62 : vector<2x16xf32>
    %64 = vector.extract_strided_slice %2 {offsets = [3, 2, 0], sizes = [1, 1, 16], strides = [1, 1, 1]} : vector<4x4x16xf32> to vector<1x1x16xf32>
    %65 = vector.shape_cast %64 : vector<1x1x16xf32> to vector<1x16xf32>
    %66 = vector.broadcast %65 : vector<1x16xf32> to vector<2x16xf32>
    %67 = arith.mulf %9, %66 : vector<2x16xf32>
    %68 = arith.addf %63, %67 : vector<2x16xf32>
    %c2_19 = arith.constant 2 : index
    %c0_20 = arith.constant 0 : index
    %69 = tpu.strided_load %arg7[%c2_19, %c0_20] {strides = array<i32: 4, 1>} : memref<8x16xf32, #tpu.memory_space<vmem>>, vector<2x16xf32>
    tpu.strided_store %arg7[%c2_19, %c0_20], %68 {strides = array<i32: 4, 1>} : memref<8x16xf32, #tpu.memory_space<vmem>>, vector<2x16xf32>
    %70 = vector.extract_strided_slice %2 {offsets = [0, 3, 0], sizes = [1, 1, 16], strides = [1, 1, 1]} : vector<4x4x16xf32> to vector<1x1x16xf32>
    %71 = vector.shape_cast %70 : vector<1x1x16xf32> to vector<1x16xf32>
    %72 = vector.broadcast %71 : vector<1x16xf32> to vector<2x16xf32>
    %73 = arith.mulf %6, %72 : vector<2x16xf32>
    %74 = vector.extract_strided_slice %2 {offsets = [1, 3, 0], sizes = [1, 1, 16], strides = [1, 1, 1]} : vector<4x4x16xf32> to vector<1x1x16xf32>
    %75 = vector.shape_cast %74 : vector<1x1x16xf32> to vector<1x16xf32>
    %76 = vector.broadcast %75 : vector<1x16xf32> to vector<2x16xf32>
    %77 = arith.mulf %7, %76 : vector<2x16xf32>
    %78 = arith.addf %73, %77 : vector<2x16xf32>
    %79 = vector.extract_strided_slice %2 {offsets = [2, 3, 0], sizes = [1, 1, 16], strides = [1, 1, 1]} : vector<4x4x16xf32> to vector<1x1x16xf32>
    %80 = vector.shape_cast %79 : vector<1x1x16xf32> to vector<1x16xf32>
    %81 = vector.broadcast %80 : vector<1x16xf32> to vector<2x16xf32>
    %82 = arith.mulf %8, %81 : vector<2x16xf32>
    %83 = arith.addf %78, %82 : vector<2x16xf32>
    %84 = vector.extract_strided_slice %2 {offsets = [3, 3, 0], sizes = [1, 1, 16], strides = [1, 1, 1]} : vector<4x4x16xf32> to vector<1x1x16xf32>
    %85 = vector.shape_cast %84 : vector<1x1x16xf32> to vector<1x16xf32>
    %86 = vector.broadcast %85 : vector<1x16xf32> to vector<2x16xf32>
    %87 = arith.mulf %9, %86 : vector<2x16xf32>
    %88 = arith.addf %83, %87 : vector<2x16xf32>
    %c3_21 = arith.constant 3 : index
    %c0_22 = arith.constant 0 : index
    %89 = tpu.strided_load %arg7[%c3_21, %c0_22] {strides = array<i32: 4, 1>} : memref<8x16xf32, #tpu.memory_space<vmem>>, vector<2x16xf32>
    tpu.strided_store %arg7[%c3_21, %c0_22], %88 {strides = array<i32: 4, 1>} : memref<8x16xf32, #tpu.memory_space<vmem>>, vector<2x16xf32>
    %c0_23 = arith.constant 0 : index
    %c0_24 = arith.constant 0 : index
    %90 = vector.load %arg7[%c0_23, %c0_24] : memref<8x16xf32, #tpu.memory_space<vmem>>, vector<8x16xf32>
    %cst_25 = arith.constant dense<0.000000e+00> : vector<8x16xf32>
    %91 = tpu.matmul %90, %1, %cst_25 {dimension_numbers = #tpu.dot_dimension_numbers<[1], [0], [0], [1], [0, 0, 1, 1], [], []>} : vector<8x16xf32>, vector<16x16xf32>, vector<8x16xf32> -> vector<8x16xf32>
    %c0_26 = arith.constant 0 : index
    %c0_27 = arith.constant 0 : index
    %92 = vector.load %arg5[%c0_26, %c0_27] : memref<8x16xf32, #tpu.memory_space<vmem>>, vector<8x16xf32>
    tpu.vector_store %arg5[%c0_26, %c0_27], %91 {strides = array<i32>} : memref<8x16xf32, #tpu.memory_space<vmem>>, vector<8x16xf32>,
    return
  }
  func.func @transform_0(%arg0: i32) -> (i32, i32) {
    %c0_i32 = arith.constant 0 : i32
    %c0_i32_0 = arith.constant 0 : i32
    return %arg0, %c0_i32 : i32, i32
  }
  func.func @transform_1(%arg0: i32) -> (i32, i32, i32) {
    %c0_i32 = arith.constant 0 : i32
    %c0_i32_0 = arith.constant 0 : i32
    %c0_i32_1 = arith.constant 0 : i32
    %c0_i32_2 = arith.constant 0 : i32
    return %c0_i32, %c0_i32_0, %c0_i32_1 : i32, i32, i32
  }
  func.func @transform_2(%arg0: i32) -> (i32, i32) {
    %c0_i32 = arith.constant 0 : i32
    %c0_i32_0 = arith.constant 0 : i32
    %c0_i32_1 = arith.constant 0 : i32
    return %c0_i32, %c0_i32_0 : i32, i32
  }
  func.func @transform_3(%arg0: i32) -> (i32, i32) {
    %c0_i32 = arith.constant 0 : i32
    %c0_i32_0 = arith.constant 0 : i32
    %c0_i32_1 = arith.constant 0 : i32
    return %c0_i32, %c0_i32_0 : i32, i32
  }
  func.func @transform_4(%arg0: i32) -> (i32, i32) {
    %c0_i32 = arith.constant 0 : i32
    %c0_i32_0 = arith.constant 0 : i32
    return %arg0, %c0_i32 : i32, i32
  }
}

</mosaic_0001>

<bundles_post_ra>
// kernel: tpu_custom_call.1
= control target key start
LH: loop header
LB: loop body
LE: loop exit
PB: predicated region body
PF: predicated region fallthrough
CT: control target
= control target key end

     0   :  { %9 = vsyncpa [#allocation5], 0  ;;  %s612_s0 = inlined_call_operand.hbm [shape: f32[8,16], index: 0, kind: input, shape index: {}]   ;;  %s613_s1 = inlined_call_operand.hbm [shape: f32[4,4,16], index: 1, kind: input, shape index: {}]   ;;  %s614_s2 = inlined_call_operand.hbm [shape: f32[16,16], index: 2, kind: input, shape index: {}]   ;;  %s615_s3 = inlined_call_operand.hbm [shape: f32[16,16], index: 3, kind: input, shape index: {}]   ;;  %s616_s4 = inlined_call_operand.hbm [shape: f32[8,16], index: 4, kind: output, shape index: {}]  }
   0x1   :  { %10 = vsyncpa [#allocation8], 0 }
   0x2   :  { %11 = vsyncpa [#allocation11], 0 }
   0x3   :  { %12 = vsyncpa [#allocation6], 0  ;;  %s511_s15 = smov [#allocation7]   ;;  %s393_s19 = scalar_lea.hbm %s613_s1, 256 }
   0x4   :  { %s28_s16 = sshll.u32 %s511_s15, 4  ;;  %p394_p0 = scmp.ne.s32.totalorder %s613_s1, %s393_s19  ;;  %s29_s16 = int_to_ptr.vmem [resolvable:$true] %s28_s16 }
   0x5   :  { %p397_p1 = scmp.lt.u32.totalorder %s393_s19, %s613_s1 }
   0x7   :  { %p399_p2 = pnand %p397_p1, %p394_p0 }
   0x9   :  { %402 = shalt.err (!%p399_p2)
}
   0xa   :  { %s403_s24 = scalar_lea.vmem %s29_s16, 256  ;;  %p408_p4 = scmp.lt.s32.totalorder %s29_s16, %s29_s16 }
   0xb   :  { %p404_p3 = scmp.ne.s32.totalorder %s29_s16, %s403_s24  ;;  %p409_p5 = scmp.lt.s32.totalorder %s403_s24, %s403_s24 }
   0xd   :  { %p410_p6 = por %p409_p5, %p408_p4 }
   0xf   :  { %p411_p7 = pnand %p410_p6, %p404_p3 }
  0x11   :  { %414 = shalt.err (!%p411_p7)
}
  0x12   :  { %s512_s25 = smov 64   ;;  %s513_s26 = smov 4  }
  0x13   :  { %34 = dma.hbm_to_vmem [thread:$0]  %s613_s1, 256, %s29_s16, [#allocation8], %s512_s25, %s512_s25, %s513_s26  }
  0x14   :  { %s514_s29 = smov [#allocation4]   ;;  %s515_s5 = smov [#allocation9]  }
  0x15   :  { %s19_s30 = sshll.u32 %s514_s29, 4  ;;  %s40_s6 = sshll.u32 %s515_s5, 4  ;;  %s20_s30 = int_to_ptr.vmem [resolvable:$true] %s19_s30  ;;  %s41_s6 = int_to_ptr.vmem [resolvable:$true] %s40_s6 }
  0x16   :  { %s415_s9 = scalar_lea.hbm %s612_s0, 128 }
  0x17   :  { %p416_p8 = scmp.ne.s32.totalorder %s612_s0, %s415_s9  ;;  %p419_p9 = scmp.lt.u32.totalorder %s415_s9, %s612_s0 }
  0x19   :  { %p421_p10 = pnand %p419_p9, %p416_p8 }
  0x1b   :  { %424 = shalt.err (!%p421_p10)
}
  0x1c   :  { %s425_s1 = scalar_lea.vmem %s20_s30, 128  ;;  %p430_p12 = scmp.lt.s32.totalorder %s20_s30, %s20_s30 }
  0x1d   :  { %p426_p11 = scmp.ne.s32.totalorder %s20_s30, %s425_s1  ;;  %p431_p13 = scmp.lt.s32.totalorder %s425_s1, %s425_s1 }
  0x1f   :  { %p432_p0 = por %p431_p13, %p430_p12 }
  0x21   :  { %p433_p1 = pnand %p432_p0, %p426_p11 }
  0x23   :  { %436 = shalt.err (!%p433_p1)
}
  0x24   :  { %22 = dma.hbm_to_vmem [thread:$0]  %s612_s0, 128, %s20_s30, [#allocation5]  }
  0x25   :  { %s437_s18 = scalar_lea.hbm %s614_s2, 256 }
  0x26   :  { %p438_p2 = scmp.ne.s32.totalorder %s614_s2, %s437_s18  ;;  %p441_p3 = scmp.lt.u32.totalorder %s437_s18, %s614_s2 }
  0x28   :  { %p443_p4 = pnand %p441_p3, %p438_p2 }
  0x2a   :  { %446 = shalt.err (!%p443_p4)
}
  0x2b   :  { %s447_s23 = scalar_lea.vmem %s41_s6, 256  ;;  %p452_p6 = scmp.lt.s32.totalorder %s41_s6, %s41_s6 }
  0x2c   :  { %p448_p5 = scmp.ne.s32.totalorder %s41_s6, %s447_s23  ;;  %p453_p7 = scmp.lt.s32.totalorder %s447_s23, %s447_s23 }
  0x2e   :  { %p454_p8 = por %p453_p7, %p452_p6 }
  0x30   :  { %p455_p9 = pnand %p454_p8, %p448_p5 }
  0x32   :  { %458 = shalt.err (!%p455_p9)
}
  0x33   :  { %s516_s0 = smov 128   ;;  %s517_s24 = smov 8  }
  0x34   :  { %46 = dma.hbm_to_vmem [thread:$0]  %s614_s2, 256, %s41_s6, [#allocation8], %s516_s0, %s516_s0, %s517_s24  }
  0x35   :  { %s518_s27 = smov [#allocation10]   ;;  %s459_s5 = scalar_lea.hbm %s615_s3, 256 }
  0x36   :  { %s52_s28 = sshll.u32 %s518_s27, 4  ;;  %p460_p10 = scmp.ne.s32.totalorder %s615_s3, %s459_s5  ;;  %s53_s28 = int_to_ptr.vmem [resolvable:$true] %s52_s28 }
  0x37   :  { %p463_p11 = scmp.lt.u32.totalorder %s459_s5, %s615_s3 }
  0x39   :  { %p465_p12 = pnand %p463_p11, %p460_p10 }
  0x3b   :  { %468 = shalt.err (!%p465_p12)
}
  0x3c   :  { %s469_s11 = scalar_lea.vmem %s53_s28, 256  ;;  %p474_p0 = scmp.lt.s32.totalorder %s53_s28, %s53_s28 }
  0x3d   :  { %p470_p13 = scmp.ne.s32.totalorder %s53_s28, %s469_s11  ;;  %p475_p1 = scmp.lt.s32.totalorder %s469_s11, %s469_s11 }
  0x3f   :  { %p476_p2 = por %p475_p1, %p474_p0 }
  0x41   :  { %p477_p3 = pnand %p476_p2, %p470_p13 }
  0x43   :  { %480 = shalt.err (!%p477_p3)
}
  0x44   :  { %58 = dma.hbm_to_vmem [thread:$0]  %s615_s3, 256, %s53_s28, [#allocation11], %s516_s0, %s516_s0, %s517_s24  }
  0x45   :  { %503 = dma.done.wait [#allocation5], 128  }
  0x46   :  { %504 = vsyncadd [#allocation5], 4294967168 }
  0x47   :  { %505 = dma.done.wait [#allocation8], 512  }
  0x48   :  { %506 = vsyncadd [#allocation8], 4294966784 }
  0x49   :  { %507 = dma.done.wait [#allocation11], 256  }
  0x4a   :  { %508 = vsyncadd [#allocation11], 4294967040  ;;  %v519_v0 = vmov 0.0|0.0   ;;  %vm520_vm0 = vmmov 0   ;;  %v521_v1 = vmov 0.0   ;;  %v71_v2 = vld [vmem:[#allocation9] sm:$0xff]  ;;  %v162_v9 = vlaneseq }
  0x4b   :  { %375 = vmatprep.subr.bf16.mxu0 %v519_v0  ;;  %365 = vmatprep.mubr.msk.f32.mxu0 %vm520_vm0, %v521_v1  ;;  %v72_v3 = vld [vmem:[#allocation9 + $0x8] sm:$0xff]  ;;  %vm80_vm1 = vcmask 130048   ;;  %v73_v6 = vld [vmem:[#allocation10] sm:$0xff]  ;;  %v74_v7 = vld [vmem:[#allocation10 + $0x8] sm:$0xff]  ;;  %s522_s3 = smov [#allocation12]  }
  0x4c   :  { %378 = vmatprep.subr.bf16.mxu1 %v519_v0  ;;  %372 = vmatprep.mubr.msk.f32.mxu1 %vm520_vm0, %v521_v1  ;;  %v376_v4 = vpack.c.bf16 %v72_v3, %v71_v2  ;;  %v79_v5 = vld [vmem:[#allocation4] sm:$0xff]  ;;  %v379_v8 = vpack.c.bf16 %v74_v7, %v73_v6  ;;  %v163_v10 = vshrl.u32 %v162_v9, 7  ;;  %v75_v15 = vld [vmem:[#allocation7] sm:$0xf]  ;;  %v76_v16 = vld [vmem:[#allocation7 + $0x4] sm:$0xf] }
  0x4d   :  { %v77_v17 = vld [vmem:[#allocation7 + $0x8] sm:$0xf]  ;;  %v78_v19 = vld [vmem:[#allocation7 + $0xc] sm:$0xf]  ;;  %s342_s12 = sshll.u32 %s522_s3, 4  ;;  %s343_s12 = int_to_ptr.vmem [resolvable:$true] %s342_s12 }
  0x4e   :  { %377 = vmatpush3.bf16.msra.mxu0 %v376_v4  ;;  %380 = vmatpush3.bf16.msra.mxu1 %v379_v8  ;;  %v164_v12 = vsub.s32 0, %v163_v10  ;;  %v188_v13 = vsub.s32 1, %v163_v10  ;;  %v213_v18 = vsub.s32 2, %v163_v10  ;;  %v238_v20 = vsub.s32 3, %v163_v10  ;;  %s481_s13 = scalar_lea.vmem %s343_s12, 128  ;;  %p486_p5 = scmp.lt.s32.totalorder %s343_s12, %s343_s12 }
  0x4f   :  { %p482_p4 = scmp.ne.s32.totalorder %s343_s12, %s481_s13  ;;  %p487_p6 = scmp.lt.s32.totalorder %s481_s13, %s481_s13 }
  0x50   :  { %v165_v21 = vrot.slane %v75_v15, %v164_v12  ;;  %v170_v22 = vrot.slane %v76_v16, %v164_v12  ;;  %v189_v23 = vrot.slane %v75_v15, %v188_v13  ;;  %v194_v24 = vrot.slane %v76_v16, %v188_v13 }
  0x51   :  { %366 = vmatmul.mubr.msk.f32.vlgmr.msra.gmra.mrb[0].mxu0 %vm80_vm1, %v79_v5  ;;  %v176_v25 = vrot.slane %v77_v17, %v164_v12  ;;  %v182_v26 = vrot.slane %v78_v19, %v164_v12  ;;  %v214_v27 = vrot.slane %v75_v15, %v213_v18  ;;  %v219_v28 = vrot.slane %v76_v16, %v213_v18  ;;  %p488_p7 = por %p487_p6, %p486_p5 }
  0x52   :  { %v200_v31 = vrot.slane %v77_v17, %v188_v13  ;;  %v225_v32 = vrot.slane %v77_v17, %v213_v18  ;;  %v239_v33 = vrot.slane %v75_v15, %v238_v20  ;;  %v244_v34 = vrot.slane %v76_v16, %v238_v20 }
  0x53   :  { %v206_v42 = vrot.slane %v78_v19, %v188_v13  ;;  %v231_v43 = vrot.slane %v78_v19, %v213_v18  ;;  %v250_v44 = vrot.slane %v77_v17, %v238_v20  ;;  %v256_v52 = vrot.slane %v78_v19, %v238_v20  ;;  %p489_p8 = pnand %p488_p7, %p482_p4 }
 0x124   :  { %v150_v11 = vpop.f32.mrb[0].mxu0 }
 0x125   :  { %154 = vst.msk [vmem:[#allocation2] sm:$0xff] %vm80_vm1, %v150_v11  ;;  %v367_v14 = vpop.f32.mrb[1].mxu0 }
 0x12c   :  { %v155_v29 = vld [vmem:[#allocation2] ss:$4 sm:$0x3]  ;;  %v157_v30 = vld [vmem:[#allocation2 + $0x1] ss:$4 sm:$0x3] }
 0x12d   :  { %v159_v35 = vld [vmem:[#allocation2 + $0x2] ss:$4 sm:$0x3]  ;;  %v166_v36 = vmul.f32 %v165_v21, %v155_v29  ;;  %v171_v37 = vmul.f32 %v170_v22, %v157_v30  ;;  %v190_v38 = vmul.f32 %v189_v23, %v155_v29  ;;  %v195_v39 = vmul.f32 %v194_v24, %v157_v30  ;;  %v161_v40 = vld [vmem:[#allocation2 + $0x3] ss:$4 sm:$0x3] }
 0x12e   :  { %v177_v41 = vmul.f32 %v176_v25, %v159_v35  ;;  %v215_v47 = vmul.f32 %v214_v27, %v155_v29  ;;  %v220_v48 = vmul.f32 %v219_v28, %v157_v30  ;;  %v201_v49 = vmul.f32 %v200_v31, %v159_v35 }
 0x12f   :  { %v172_v45 = vadd.f32 %v171_v37, %v166_v36  ;;  %v196_v46 = vadd.f32 %v195_v39, %v190_v38  ;;  %v240_v50 = vmul.f32 %v239_v33, %v155_v29  ;;  %v245_v51 = vmul.f32 %v244_v34, %v157_v30 }
 0x130   :  { %v183_v53 = vmul.f32 %v182_v26, %v161_v40  ;;  %v221_v54 = vadd.f32 %v220_v48, %v215_v47  ;;  %v226_v55 = vmul.f32 %v225_v32, %v159_v35  ;;  %v207_v57 = vmul.f32 %v206_v42, %v161_v40 }
 0x131   :  { %v178_v56 = vadd.f32 %v177_v41, %v172_v45  ;;  %v246_v58 = vadd.f32 %v245_v51, %v240_v50  ;;  %v251_v59 = vmul.f32 %v250_v44, %v159_v35  ;;  %v202_v60 = vadd.f32 %v201_v49, %v196_v46 }
 0x132   :  { %v232_v61 = vmul.f32 %v231_v43, %v161_v40  ;;  %v227_v63 = vadd.f32 %v226_v55, %v221_v54  ;;  %v257_v0 = vmul.f32 %v256_v52, %v161_v40 }
 0x133   :  { %v184_v62 = vadd.f32 %v183_v53, %v178_v56  ;;  %v208_v1 = vadd.f32 %v207_v57, %v202_v60  ;;  %v252_v2 = vadd.f32 %v251_v59, %v246_v58 }
 0x134   :  { %v233_v3 = vadd.f32 %v232_v61, %v227_v63 }
 0x135   :  { %185 = vst [vmem:[#allocation3] ss:$4 sm:$0x3] %v184_v62  ;;  %210 = vst [vmem:[#allocation3 + $0x1] ss:$4 sm:$0x3] %v208_v1  ;;  %v258_v4 = vadd.f32 %v257_v0, %v252_v2 }
 0x136   :  { %235 = vst [vmem:[#allocation3 + $0x2] ss:$4 sm:$0x3] %v233_v3 }
 0x137   :  { %260 = vst [vmem:[#allocation3 + $0x3] ss:$4 sm:$0x3] %v258_v4 }
 0x13e   :  { %v261_v5 = vld [vmem:[#allocation3] sm:$0xff] }
 0x13f   :  { %373 = vmatmul.mubr.msk.f32.vlgmr.msra.gmra.mrb[0].mxu1 %vm80_vm1, %v261_v5 }
 0x212   :  { %v331_v6 = vpop.f32.mrb[0].mxu1 }
 0x213   :  { %335 = vst.msk [vmem:[#allocation12] sm:$0xff] %vm80_vm1, %v331_v6  ;;  %v374_v7 = vpop.f32.mrb[1].mxu1 }
 0x214   :  { %492 = shalt.err (!%p489_p8)
}
 0x215   :  { %s493_s15 = scalar_lea.hbm %s616_s4, 128 }
 0x216   :  { %p494_p9 = scmp.ne.s32.totalorder %s616_s4, %s493_s15  ;;  %p497_p10 = scmp.lt.u32.totalorder %s493_s15, %s616_s4 }
 0x218   :  { %p499_p11 = pnand %p497_p10, %p494_p9 }
 0x21a   :  { %502 = shalt.err (!%p499_p11)
}
 0x21b   :  { %345 = dma.vmem_to_hbm [thread:$0]  %s343_s12, 128, %s616_s4, [#allocation6]  }
 0x21c   :  { %509 = dma.done.wait [#allocation6], 128  }
 0x21d   :  { %510 = vsyncadd [#allocation6], 4294967168 }
 0x21e   :  { %349 = vsyncpa [#allocation5], 1 }
 0x21f   :  { %350 = vsyncpa [#allocation8], 1 }
 0x220   :  { %351 = vsyncpa [#allocation11], 1 }
 0x221   :  { %352 = vsyncpa [#allocation6], 1 }

</bundles_post_ra>
